<compile_context>
chip_gen: v6e
topology: v6e:2x2x1
jax: 0.10.0
libtpu: 0.0.40
codegen_flags: <defaults>
</compile_context>

<pallas_src>
import functools

import jax
import jax.numpy as jnp
from jax import lax
from jax.experimental import pallas as pl
from jax.experimental.pallas import tpu as pltpu

EPS = 1e-5


# ----------------------------------------------------------------------------
# VMEM budgeting / tiling helpers
# ----------------------------------------------------------------------------
@functools.lru_cache(maxsize=1)
def _vmem_limit_bytes():
    """Scoped-VMEM budget: ~half of physical VMEM (64 MiB on v5e/v6e's 128 MiB parts,
    32 MiB on v7x's 64 MiB parts).  Falls back to the always-safe 32 MiB."""
    try:
        phys = int(getattr(pltpu.get_tpu_info(), "vmem_capacity_bytes"))
        return max(16 << 20, min(96 << 20, phys // 2))
    except Exception:
        return 32 << 20


def _compiler_params():
    return pltpu.CompilerParams(
        dimension_semantics=("parallel", "parallel"),
        vmem_limit_bytes=_vmem_limit_bytes(),
    )


def _pick_row_block(h_out, bytes_per_row, cap=None):
    """Largest multiple-of-8 divisor of h_out whose double-buffered working set fits in
    ~35% of the scoped-VMEM budget (fallback: h_out itself -> single block)."""
    budget = int(_vmem_limit_bytes() * 0.35)
    rows = max(8, budget // max(1, 2 * bytes_per_row))
    if cap is not None:
        rows = min(rows, cap)
    rows = min(rows, h_out)
    best = None
    for t in range(8, rows + 1, 8):
        if h_out % t == 0:
            best = t
    return best if best is not None else h_out


def _pick_pw_group(w_out, c_in, c_out, lane_cap):
    """Spatial group size for the block-diagonal 1x1 weight: largest divisor of w_out with
    g*max(C_in, C_out) <= lane_cap (bounds MXU contraction depth and weight footprint)."""
    cmax = max(c_in, c_out)
    g = 1
    for t in range(1, w_out + 1):
        if w_out % t == 0 and t * cmax <= lane_cap:
            g = t
    return g


# ----------------------------------------------------------------------------
# Fused stage kernel:
#   (ReLU [+ BN-affine]) + k*k depthwise + 1x1 pointwise + packed BN partials
#   over one (Rb + halo)-row block in the merged (rows, W*C) layout.
# ----------------------------------------------------------------------------
def _fused_stage_kernel(*refs, k, s, C, Cout, Rb, Wo, halo, pad, h_in, g, affine):
    if affine:
        x_ref, wdw_ref, wpw_ref, aff_ref, y_ref, st_ref = refs
    else:
        x_ref, wdw_ref, wpw_ref, y_ref, st_ref = refs

    rows_in = Rb + halo
    if affine:
        # Padded-image row index of each local row; rows outside [pad, pad + h_in) are zero
        # padding and must stay zero after affine+relu (shift != 0 would otherwise leak
        # through the relu).  Replaces the old full-size (Hp, Wp*C) mask input.
        r0 = pl.program_id(1) * Rb
        rid = r0 + lax.broadcasted_iota(jnp.int32, (rows_in, 1), 0)
        row_ok = (rid >= pad) & (rid < pad + h_in)

    # Pre-activation hoisted out of the tap loop (once per polyphase phase).
    phases = []
    for p in range(s * s):
        xp = x_ref[p]                                            # (rows_in, Wq*C)
        if affine:
            # aff rows already carry the column (W-padding) mask folded in.
            xp = jnp.maximum(xp * aff_ref[0:1, :] + aff_ref[1:2, :], 0.0)
            xp = jnp.where(row_ok, xp, 0.0)
        else:
            xp = jnp.maximum(xp, 0.0)                            # relu(pad(x)) == pad(relu(x))
        phases.append(xp)

    # Column (kw) lane shifts hoisted out of the kh loop: each distinct (phase, dc) shift is
    # materialized once instead of once per tap.
    col_views = {}
    for kh in range(k):
        for kw in range(k):
            ph, dc = (kh % s) * s + (kw % s), kw // s
            if (ph, dc) not in col_views:
                col_views[(ph, dc)] = phases[ph][:, dc * C:dc * C + Wo * C]

    # Depthwise tap accumulation; one independent accumulator per kh row breaks the add
    # latency chain (helps v5e's FMA-less VALU, neutral-to-positive on v6e/v7x).
    partials = []
    for kh in range(k):
        dr = kh // s
        acc = None
        for kw in range(k):
            ph, dc = (kh % s) * s + (kw % s), kw // s
            win = col_views[(ph, dc)][dr:dr + Rb, :]
            term = win * wdw_ref[kh * k + kw:kh * k + kw + 1, :]  # weights pre-tiled to lanes
            acc = term if acc is None else acc + term
        partials.append(acc)
    d = functools.reduce(lambda a, b: a + b, partials)            # (Rb, Wo*C)

    # Fused 1x1 conv: block-diagonal MXU matmul directly on the merged layout, in W-groups of
    # g positions, plus packed lane-dense BN (sum, sumsq) partials over this block's rows.
    # TODO(synk): cast d / weights to bf16 (f32 accumulate) for production channel counts.
    n_grp = Wo // g
    for j in range(n_grp):
        dg = d[:, j * g * C:(j + 1) * g * C]
        yg = jnp.dot(dg, wpw_ref[...], preferred_element_type=jnp.float32)  # (Rb, g*Cout)
        lo, hi = j * g * Cout, (j + 1) * g * Cout
        y_ref[:, lo:hi] = yg
        st_ref[0:1, lo:hi] = jnp.sum(yg, axis=0, keepdims=True)
        st_ref[1:2, lo:hi] = jnp.sum(yg * yg, axis=0, keepdims=True)


def _fused_stage(x_nhwc, w_dw, w_pw, *, k, stride, padding, scale=None, shift=None,
                 row_block_cap=None, pw_group_lanes=512):
    """One SepConv stage: (ReLU [+BN affine]) + depthwise + 1x1 + BN partial stats.

    x_nhwc: (N, H, W, C) f32.  w_dw: PyTorch depthwise weight (C, 1, k, k).
    w_pw: (C, Cout) 1x1 weight (already transposed).  scale/shift fold the preceding
    BatchNorm (per channel) into this kernel (only used for the stride-1 second stage).
    Returns y merged (N, Ho, Wo*Cout), per-channel (sum, sumsq) totals, and (N, Ho, Wo).
    """
    N, H, W, C = x_nhwc.shape
    Cout = w_pw.shape[1]
    s = stride
    affine = scale is not None
    assert not (affine and s != 1), "BN folding is only used for the stride-1 second stage"

    Hp, Wp = H + 2 * padding, W + 2 * padding
    Ho, Wo = (Hp - k) // s + 1, (Wp - k) // s + 1
    halo = (k - 1) // s
    Hq, Wq = Ho + halo, Wo + halo

    # Row-block size from the VMEM budget (input phases + output, double-buffered).
    bytes_per_row = 4 * (s * s * Wq * C + Wo * Cout)
    Rb = _pick_row_block(Ho, bytes_per_row, cap=row_block_cap)
    n_blk = Ho // Rb
    g = _pick_pw_group(Wo, C, Cout, pw_group_lanes)

    # ---- wrapper-side relayout: pad (+ polyphase for stride>1) + row-block with halo ----
    # XLA fuses this with the preceding transpose/reshape into a single relayout pass.
    # TODO(synk): move padding / halo handling fully into the kernel (in-kernel zero-fill and
    # element-offset halo reads) so this wrapper pass disappears entirely.
    xp = jnp.pad(x_nhwc, ((0, 0), (padding, padding), (padding, padding), (0, 0)))
    if s == 1:
        xph = xp.reshape(N, 1, Hq, Wq * C)
    else:
        He, We = max(Hp, s * Hq), max(Wp, s * Wq)
        xe = jnp.pad(xp, ((0, 0), (0, He - Hp), (0, We - Wp), (0, 0)))
        phs = [xe[:, r::s, q::s, :][:, :Hq, :Wq, :] for r in range(s) for q in range(s)]
        xph = jnp.stack(phs, axis=1).reshape(N, s * s, Hq, Wq * C)
    xb = jnp.stack([xph[:, :, i * Rb:i * Rb + Rb + halo, :] for i in range(n_blk)], axis=1)
    # xb: (N, n_blk, s*s, Rb+halo, Wq*C)

    # Depthwise weights pre-tiled to the merged lane width; 1x1 weights as a per-group
    # block-diagonal (g*C, g*Cout) matrix so the matmul runs directly on the merged layout.
    w_taps = jnp.stack([jnp.tile(w_dw[:, 0, kh, kw], Wo)
                        for kh in range(k) for kw in range(k)])              # (k*k, Wo*C)
    w_blk = jnp.kron(jnp.eye(g, dtype=jnp.float32), w_pw.astype(jnp.float32))  # (g*C, g*Cout)

    args = [xb, w_taps, w_blk]
    in_specs = [
        pl.BlockSpec((None, None, s * s, Rb + halo, Wq * C), lambda n, i: (n, i, 0, 0, 0)),
        pl.BlockSpec((k * k, Wo * C), lambda n, i: (0, 0)),
        pl.BlockSpec((g * C, g * Cout), lambda n, i: (0, 0)),
    ]
    if affine:
        lane = jnp.arange(Wq * C) // C
        colmask = ((lane >= padding) & (lane < padding + W)).astype(jnp.float32)
        aff = jnp.stack([jnp.tile(scale, Wq) * colmask,
                         jnp.tile(shift, Wq) * colmask])                     # (2, Wq*C)
        args.append(aff)
        in_specs.append(pl.BlockSpec((2, Wq * C), lambda n, i: (0, 0)))

    y, st = pl.pallas_call(
        functools.partial(_fused_stage_kernel, k=k, s=s, C=C, Cout=Cout, Rb=Rb, Wo=Wo,
                          halo=halo, pad=padding, h_in=H, g=g, affine=affine),
        out_shape=(jax.ShapeDtypeStruct((N, Ho, Wo * Cout), jnp.float32),
                   jax.ShapeDtypeStruct((N, n_blk, 2, Wo * Cout), jnp.float32)),
        grid=(N, n_blk),
        in_specs=in_specs,
        out_specs=(pl.BlockSpec((None, Rb, Wo * Cout), lambda n, i: (n, i, 0)),
                   pl.BlockSpec((None, None, 2, Wo * Cout), lambda n, i: (n, i, 0, 0))),
        compiler_params=_compiler_params(),
    )(*args)

    # Tiny wrapper-side reduction of the packed per-block partials -> per-channel totals.
    tot = jnp.sum(st, axis=(0, 1)).reshape(2, Wo, Cout).sum(axis=1)          # (2, Cout)
    return y, tot, (N, Ho, Wo)


def _stats_to_affine(tot, m):
    """(sum, sumsq) -> train-mode BatchNorm per-channel scale/shift (gamma=1, beta=0)."""
    mean = tot[0] / m
    var = jnp.maximum(tot[1] / m - mean * mean, 0.0)   # biased batch variance
    # TODO(synk): use a Welford / centered-sum merge for production-sized M (f32 E[x^2]-E[x]^2
    # cancels catastrophically when |mean| >> std).
    inv = lax.rsqrt(var + EPS)
    return inv, -mean * inv


# ----------------------------------------------------------------------------
# SepConv forward
# ----------------------------------------------------------------------------
@functools.partial(jax.jit, static_argnames=("kernel_size", "stride", "padding",
                                             "C_in", "C_out", "row_block_cap",
                                             "pw_group_lanes"))
def sep_conv_forward(x_nchw, tw, *, kernel_size, stride, padding, C_in, C_out,
                     row_block_cap=None, pw_group_lanes=512):
    k = kernel_size
    # NCHW -> NHWC; fuses with stage 1's pad/blocking relayout inside this jit.
    x = jnp.transpose(x_nchw, (0, 2, 3, 1)).astype(jnp.float32)

    # Stage 1: relu + depthwise(k, stride) + 1x1 + BN-1 partial stats  (one fused kernel).
    y1, tot1, (N, H1, W1) = _fused_stage(
        x, tw["dw1"], tw["pw1"][:, :, 0, 0].T, k=k, stride=stride, padding=padding,
        row_block_cap=row_block_cap, pw_group_lanes=pw_group_lanes)
    s1, b1 = _stats_to_affine(tot1, N * H1 * W1)

    # Stage 2: BN-1 affine + relu + depthwise(k, 1) + 1x1 + BN-2 partial stats (one fused kernel).
    y2, tot2, (N, H2, W2) = _fused_stage(
        y1.reshape(N, H1, W1, C_in), tw["dw2"], tw["pw2"][:, :, 0, 0].T, k=k, stride=1,
        padding=padding, scale=s1, shift=b1,
        row_block_cap=row_block_cap, pw_group_lanes=pw_group_lanes)
    s2, b2 = _stats_to_affine(tot2, N * H2 * W2)

    # BN-2 apply folded into the final NHWC->NCHW relayout: one fused XLA pass instead of the
    # old separate bn_apply kernel + transpose (BN-2 needs global batch stats, so it cannot be
    # fused into the stage-2 kernel itself).
    # TODO(synk): emit NCHW directly from a Pallas epilogue (strided lane de-interleave).
    out = y2.reshape(N, H2, W2, C_out) * s2 + b2
    return jnp.transpose(out, (0, 3, 1, 2))


# ----------------------------------------------------------------------------
# Pure-JAX reference (lax convs, NCHW) for correctness check
# ----------------------------------------------------------------------------
def sep_conv_reference(x, tw, *, C_in, stride, padding):
    dn = ("NCHW", "OIHW", "NCHW")
    pad2 = [(padding, padding), (padding, padding)]

    def bn(y):  # gamma=1, beta=0, batch stats, biased var (PyTorch train mode)
        mean = y.mean(axis=(0, 2, 3), keepdims=True)
        var = ((y - mean) ** 2).mean(axis=(0, 2, 3), keepdims=True)
        return (y - mean) * lax.rsqrt(var + EPS)

    y = jnp.maximum(x, 0.0)
    y = lax.conv_general_dilated(y, tw["dw1"], (stride, stride), pad2,
                                 feature_group_count=C_in, dimension_numbers=dn)
    y = lax.conv_general_dilated(y, tw["pw1"], (1, 1), [(0, 0), (0, 0)], dimension_numbers=dn)
    y = bn(y)
    y = jnp.maximum(y, 0.0)
    y = lax.conv_general_dilated(y, tw["dw2"], (1, 1), pad2,
                                 feature_group_count=C_in, dimension_numbers=dn)
    y = lax.conv_general_dilated(y, tw["pw2"], (1, 1), [(0, 0), (0, 0)], dimension_numbers=dn)
    return bn(y)


if __name__ == "__main__":
    N, C_in, C_out, H, W = 2, 4, 8, 16, 16
    kernel_size, padding = 3, 1

    key = jax.random.PRNGKey(0)
    kx, k1, k2, k3, k4 = jax.random.split(key, 5)
    x = jax.random.normal(kx, (N, C_in, H, W), dtype=jnp.float32)

    # PyTorch-shaped weights (deterministic init)
    tw = {
        "dw1": 0.2 * jax.random.normal(k1, (C_in, 1, kernel_size, kernel_size), jnp.float32),
        "pw1": 0.2 * jax.random.normal(k2, (C_in, C_in, 1, 1), jnp.float32),
        "dw2": 0.2 * jax.random.normal(k3, (C_in, 1, kernel_size, kernel_size), jnp.float32),
        "pw2": 0.2 * jax.random.normal(k4, (C_out, C_in, 1, 1), jnp.float32),
    }

    # Configs: default tiling, forced multi-row-block (halo path), strided polyphase path,
    # and forced multi-group pointwise path.
    configs = [
        dict(stride=1, row_block_cap=None, pw_group_lanes=512),
        dict(stride=1, row_block_cap=8, pw_group_lanes=512),
        dict(stride=2, row_block_cap=None, pw_group_lanes=512),
        dict(stride=1, row_block_cap=8, pw_group_lanes=32),
    ]
    for cfg in configs:
        out = jax.block_until_ready(sep_conv_forward(
            x, tw, kernel_size=kernel_size, stride=cfg["stride"], padding=padding,
            C_in=C_in, C_out=C_out, row_block_cap=cfg["row_block_cap"],
            pw_group_lanes=cfg["pw_group_lanes"]))
        ref = jax.block_until_ready(sep_conv_reference(
            x, tw, C_in=C_in, stride=cfg["stride"], padding=padding))
        assert out.shape == ref.shape, (cfg, out.shape, ref.shape)
        max_err = float(jnp.max(jnp.abs(out - ref)))
        assert jnp.allclose(out, ref, atol=2e-3, rtol=2e-3), (cfg, max_err)

    print("KERNEL_OK")
</pallas_src>

<mosaic_0001>
module attributes {stable_mosaic.version = 11 : i64} {
  func.func @_fused_stage_kernel(%arg0: i32, %arg1: i32, %arg2: memref<1x1x1x18x72xf32, #tpu.memory_space<vmem>>, %arg3: memref<9x64xf32, #tpu.memory_space<vmem>>, %arg4: memref<64x64xf32, #tpu.memory_space<vmem>>, %arg5: memref<1x16x64xf32, #tpu.memory_space<vmem>>, %arg6: memref<1x1x2x64xf32, #tpu.memory_space<vmem>>) attributes {dimension_semantics = [#tpu.dimension_semantics<parallel>, #tpu.dimension_semantics<parallel>], iteration_bounds = array<i64: 2, 1>, scalar_prefetch = 0 : i64, scratch_operands = 0 : i64, tpu.core_type = #tpu.core_type<tc>, window_params = [{transform_indices = @transform_0, window_bounds = array<i64: 1, 1, 1, 18, 72>}, {pipeline_mode = #tpu.pipeline_mode<synchronous>, transform_indices = @transform_1, window_bounds = array<i64: 9, 64>}, {pipeline_mode = #tpu.pipeline_mode<synchronous>, transform_indices = @transform_2, window_bounds = array<i64: 64, 64>}, {transform_indices = @transform_3, window_bounds = array<i64: 1, 16, 64>}, {transform_indices = @transform_4, window_bounds = array<i64: 1, 1, 2, 64>}]} {
    %c0 = arith.constant 0 : index
    %c0_0 = arith.constant 0 : index
    %c0_1 = arith.constant 0 : index
    %c0_2 = arith.constant 0 : index
    %c0_3 = arith.constant 0 : index
    %0 = vector.load %arg2[%c0, %c0_0, %c0_1, %c0_2, %c0_3] : memref<1x1x1x18x72xf32, #tpu.memory_space<vmem>>, vector<1x1x1x18x72xf32>
    %1 = vector.shape_cast %0 : vector<1x1x1x18x72xf32> to vector<18x72xf32>
    %cst = arith.constant 0.000000e+00 : f32
    %2 = vector.broadcast %cst : f32 to vector<18x72xf32>
    %3 = arith.maximumf %1, %2 : vector<18x72xf32>
    %4 = vector.extract_strided_slice %3 {offsets = [0, 0], sizes = [18, 64], strides = [1, 1]} : vector<18x72xf32> to vector<18x64xf32>
    %5 = vector.extract_strided_slice %3 {offsets = [0, 4], sizes = [18, 64], strides = [1, 1]} : vector<18x72xf32> to vector<18x64xf32>
    %6 = vector.extract_strided_slice %3 {offsets = [0, 8], sizes = [18, 64], strides = [1, 1]} : vector<18x72xf32> to vector<18x64xf32>
    %7 = vector.extract_strided_slice %4 {offsets = [0, 0], sizes = [16, 64], strides = [1, 1]} : vector<18x64xf32> to vector<16x64xf32>
    %c0_4 = arith.constant 0 : index
    %c0_5 = arith.constant 0 : index
    %8 = vector.load %arg3[%c0_4, %c0_5] : memref<9x64xf32, #tpu.memory_space<vmem>>, vector<1x64xf32>
    %9 = vector.broadcast %8 : vector<1x64xf32> to vector<16x64xf32>
    %10 = arith.mulf %7, %9 : vector<16x64xf32>
    %11 = vector.extract_strided_slice %5 {offsets = [0, 0], sizes = [16, 64], strides = [1, 1]} : vector<18x64xf32> to vector<16x64xf32>
    %c1 = arith.constant 1 : index
    %c0_6 = arith.constant 0 : index
    %12 = vector.load %arg3[%c1, %c0_6] : memref<9x64xf32, #tpu.memory_space<vmem>>, vector<1x64xf32>
    %13 = vector.broadcast %12 : vector<1x64xf32> to vector<16x64xf32>
    %14 = arith.mulf %11, %13 : vector<16x64xf32>
    %15 = arith.addf %10, %14 : vector<16x64xf32>
    %16 = vector.extract_strided_slice %6 {offsets = [0, 0], sizes = [16, 64], strides = [1, 1]} : vector<18x64xf32> to vector<16x64xf32>
    %c2 = arith.constant 2 : index
    %c0_7 = arith.constant 0 : index
    %17 = vector.load %arg3[%c2, %c0_7] : memref<9x64xf32, #tpu.memory_space<vmem>>, vector<1x64xf32>
    %18 = vector.broadcast %17 : vector<1x64xf32> to vector<16x64xf32>
    %19 = arith.mulf %16, %18 : vector<16x64xf32>
    %20 = arith.addf %15, %19 : vector<16x64xf32>
    %21 = vector.extract_strided_slice %4 {offsets = [1, 0], sizes = [16, 64], strides = [1, 1]} : vector<18x64xf32> to vector<16x64xf32>
    %c3 = arith.constant 3 : index
    %c0_8 = arith.constant 0 : index
    %22 = vector.load %arg3[%c3, %c0_8] : memref<9x64xf32, #tpu.memory_space<vmem>>, vector<1x64xf32>
    %23 = vector.broadcast %22 : vector<1x64xf32> to vector<16x64xf32>
    %24 = arith.mulf %21, %23 : vector<16x64xf32>
    %25 = vector.extract_strided_slice %5 {offsets = [1, 0], sizes = [16, 64], strides = [1, 1]} : vector<18x64xf32> to vector<16x64xf32>
    %c4 = arith.constant 4 : index
    %c0_9 = arith.constant 0 : index
    %26 = vector.load %arg3[%c4, %c0_9] : memref<9x64xf32, #tpu.memory_space<vmem>>, vector<1x64xf32>
    %27 = vector.broadcast %26 : vector<1x64xf32> to vector<16x64xf32>
    %28 = arith.mulf %25, %27 : vector<16x64xf32>
    %29 = arith.addf %24, %28 : vector<16x64xf32>
    %30 = vector.extract_strided_slice %6 {offsets = [1, 0], sizes = [16, 64], strides = [1, 1]} : vector<18x64xf32> to vector<16x64xf32>
    %c5 = arith.constant 5 : index
    %c0_10 = arith.constant 0 : index
    %31 = vector.load %arg3[%c5, %c0_10] : memref<9x64xf32, #tpu.memory_space<vmem>>, vector<1x64xf32>
    %32 = vector.broadcast %31 : vector<1x64xf32> to vector<16x64xf32>
    %33 = arith.mulf %30, %32 : vector<16x64xf32>
    %34 = arith.addf %29, %33 : vector<16x64xf32>
    %35 = vector.extract_strided_slice %4 {offsets = [2, 0], sizes = [16, 64], strides = [1, 1]} : vector<18x64xf32> to vector<16x64xf32>
    %c6 = arith.constant 6 : index
    %c0_11 = arith.constant 0 : index
    %36 = vector.load %arg3[%c6, %c0_11] : memref<9x64xf32, #tpu.memory_space<vmem>>, vector<1x64xf32>
    %37 = vector.broadcast %36 : vector<1x64xf32> to vector<16x64xf32>
    %38 = arith.mulf %35, %37 : vector<16x64xf32>
    %39 = vector.extract_strided_slice %5 {offsets = [2, 0], sizes = [16, 64], strides = [1, 1]} : vector<18x64xf32> to vector<16x64xf32>
    %c7 = arith.constant 7 : index
    %c0_12 = arith.constant 0 : index
    %40 = vector.load %arg3[%c7, %c0_12] : memref<9x64xf32, #tpu.memory_space<vmem>>, vector<1x64xf32>
    %41 = vector.broadcast %40 : vector<1x64xf32> to vector<16x64xf32>
    %42 = arith.mulf %39, %41 : vector<16x64xf32>
    %43 = arith.addf %38, %42 : vector<16x64xf32>
    %44 = vector.extract_strided_slice %6 {offsets = [2, 0], sizes = [16, 64], strides = [1, 1]} : vector<18x64xf32> to vector<16x64xf32>
    %c8 = arith.constant 8 : index
    %c0_13 = arith.constant 0 : index
    %45 = vector.load %arg3[%c8, %c0_13] : memref<9x64xf32, #tpu.memory_space<vmem>>, vector<1x64xf32>
    %46 = vector.broadcast %45 : vector<1x64xf32> to vector<16x64xf32>
    %47 = arith.mulf %44, %46 : vector<16x64xf32>
    %48 = arith.addf %43, %47 : vector<16x64xf32>
    %49 = arith.addf %20, %34 : vector<16x64xf32>
    %50 = arith.addf %49, %48 : vector<16x64xf32>
    %c0_14 = arith.constant 0 : index
    %c0_15 = arith.constant 0 : index
    %51 = vector.load %arg4[%c0_14, %c0_15] : memref<64x64xf32, #tpu.memory_space<vmem>>, vector<64x64xf32>
    %cst_16 = arith.constant dense<0.000000e+00> : vector<16x64xf32>
    %52 = tpu.matmul %50, %51, %cst_16 {dimension_numbers = #tpu.dot_dimension_numbers<[1], [0], [0], [1], [0, 0, 1, 1], [], []>} : vector<16x64xf32>, vector<64x64xf32>, vector<16x64xf32> -> vector<16x64xf32>
    %c0_17 = arith.constant 0 : index
    %c0_18 = arith.constant 0 : index
    %c0_19 = arith.constant 0 : index
    %53 = vector.load %arg5[%c0_17, %c0_18, %c0_19] : memref<1x16x64xf32, #tpu.memory_space<vmem>>, vector<1x16x64xf32>
    %54 = vector.shape_cast %53 : vector<1x16x64xf32> to vector<16x64xf32>
    %55 = vector.shape_cast %52 : vector<16x64xf32> to vector<1x16x64xf32>
    tpu.vector_store %arg5[%c0_17, %c0_18, %c0_19], %55 {strides = array<i32>} : memref<1x16x64xf32, #tpu.memory_space<vmem>>, vector<1x16x64xf32>,
    %cst_20 = arith.constant dense<0.000000e+00> : vector<64xf32>
    %56 = vector.multi_reduction <add>, %52, %cst_20 [0] : vector<16x64xf32> to vector<64xf32>
    %57 = vector.shape_cast %56 : vector<64xf32> to vector<1x64xf32>
    %c0_21 = arith.constant 0 : index
    %c0_22 = arith.constant 0 : index
    %c0_23 = arith.constant 0 : index
    %c0_24 = arith.constant 0 : index
    %58 = vector.load %arg6[%c0_21, %c0_22, %c0_23, %c0_24] : memref<1x1x2x64xf32, #tpu.memory_space<vmem>>, vector<1x1x1x64xf32>
    %59 = vector.shape_cast %58 : vector<1x1x1x64xf32> to vector<1x64xf32>
    %60 = vector.shape_cast %57 : vector<1x64xf32> to vector<1x1x1x64xf32>
    tpu.vector_store %arg6[%c0_21, %c0_22, %c0_23, %c0_24], %60 {strides = array<i32>} : memref<1x1x2x64xf32, #tpu.memory_space<vmem>>, vector<1x1x1x64xf32>,
    %61 = arith.mulf %52, %52 : vector<16x64xf32>
    %cst_25 = arith.constant dense<0.000000e+00> : vector<64xf32>
    %62 = vector.multi_reduction <add>, %61, %cst_25 [0] : vector<16x64xf32> to vector<64xf32>
    %63 = vector.shape_cast %62 : vector<64xf32> to vector<1x64xf32>
    %c0_26 = arith.constant 0 : index
    %c0_27 = arith.constant 0 : index
    %c1_28 = arith.constant 1 : index
    %c0_29 = arith.constant 0 : index
    %64 = vector.load %arg6[%c0_26, %c0_27, %c1_28, %c0_29] : memref<1x1x2x64xf32, #tpu.memory_space<vmem>>, vector<1x1x1x64xf32>
    %65 = vector.shape_cast %64 : vector<1x1x1x64xf32> to vector<1x64xf32>
    %66 = vector.shape_cast %63 : vector<1x64xf32> to vector<1x1x1x64xf32>
    tpu.vector_store %arg6[%c0_26, %c0_27, %c1_28, %c0_29], %66 {strides = array<i32>} : memref<1x1x2x64xf32, #tpu.memory_space<vmem>>, vector<1x1x1x64xf32>,
    return
  }
  func.func @transform_0(%arg0: i32, %arg1: i32) -> (i32, i32, i32, i32, i32) {
    %c0_i32 = arith.constant 0 : i32
    %c0_i32_0 = arith.constant 0 : i32
    %c0_i32_1 = arith.constant 0 : i32
    %c0_i32_2 = arith.constant 0 : i32
    return %arg0, %arg1, %c0_i32, %c0_i32_0, %c0_i32_1 : i32, i32, i32, i32, i32
  }
  func.func @transform_1(%arg0: i32, %arg1: i32) -> (i32, i32) {
    %c0_i32 = arith.constant 0 : i32
    %c0_i32_0 = arith.constant 0 : i32
    %c0_i32_1 = arith.constant 0 : i32
    return %c0_i32, %c0_i32_0 : i32, i32
  }
  func.func @transform_2(%arg0: i32, %arg1: i32) -> (i32, i32) {
    %c0_i32 = arith.constant 0 : i32
    %c0_i32_0 = arith.constant 0 : i32
    %c0_i32_1 = arith.constant 0 : i32
    return %c0_i32, %c0_i32_0 : i32, i32
  }
  func.func @transform_3(%arg0: i32, %arg1: i32) -> (i32, i32, i32) {
    %c0_i32 = arith.constant 0 : i32
    %c0_i32_0 = arith.constant 0 : i32
    return %arg0, %arg1, %c0_i32 : i32, i32, i32
  }
  func.func @transform_4(%arg0: i32, %arg1: i32) -> (i32, i32, i32, i32) {
    %c0_i32 = arith.constant 0 : i32
    %c0_i32_0 = arith.constant 0 : i32
    %c0_i32_1 = arith.constant 0 : i32
    return %arg0, %arg1, %c0_i32, %c0_i32_0 : i32, i32, i32, i32
  }
}

module attributes {stable_mosaic.version = 11 : i64} {
  func.func @_fused_stage_kernel(%arg0: i32, %arg1: i32, %arg2: memref<1x1x1x18x72xf32, #tpu.memory_space<vmem>>, %arg3: memref<9x64xf32, #tpu.memory_space<vmem>>, %arg4: memref<64x128xf32, #tpu.memory_space<vmem>>, %arg5: memref<2x72xf32, #tpu.memory_space<vmem>>, %arg6: memref<1x16x128xf32, #tpu.memory_space<vmem>>, %arg7: memref<1x1x2x128xf32, #tpu.memory_space<vmem>>) attributes {dimension_semantics = [#tpu.dimension_semantics<parallel>, #tpu.dimension_semantics<parallel>], iteration_bounds = array<i64: 2, 1>, scalar_prefetch = 0 : i64, scratch_operands = 0 : i64, tpu.core_type = #tpu.core_type<tc>, window_params = [{transform_indices = @transform_0, window_bounds = array<i64: 1, 1, 1, 18, 72>}, {pipeline_mode = #tpu.pipeline_mode<synchronous>, transform_indices = @transform_1, window_bounds = array<i64: 9, 64>}, {pipeline_mode = #tpu.pipeline_mode<synchronous>, transform_indices = @transform_2, window_bounds = array<i64: 64, 128>}, {pipeline_mode = #tpu.pipeline_mode<synchronous>, transform_indices = @transform_3, window_bounds = array<i64: 2, 72>}, {transform_indices = @transform_4, window_bounds = array<i64: 1, 16, 128>}, {transform_indices = @transform_5, window_bounds = array<i64: 1, 1, 2, 128>}]} {
    %c16_i32 = arith.constant 16 : i32
    %0 = arith.muli %arg1, %c16_i32 : i32
    %1 = tpu.iota {dimensions = array<i32: 0>} : vector<18x1xi32>
    %2 = vector.broadcast %0 : i32 to vector<18x1xi32>
    %3 = arith.addi %2, %1 : vector<18x1xi32>
    %c1_i32 = arith.constant 1 : i32
    %4 = vector.broadcast %c1_i32 : i32 to vector<18x1xi32>
    %5 = arith.cmpi sge, %3, %4 : vector<18x1xi32>
    %c17_i32 = arith.constant 17 : i32
    %6 = vector.broadcast %c17_i32 : i32 to vector<18x1xi32>
    %7 = arith.cmpi slt, %3, %6 : vector<18x1xi32>
    %8 = arith.andi %5, %7 : vector<18x1xi1>
    %c0 = arith.constant 0 : index
    %c0_0 = arith.constant 0 : index
    %c0_1 = arith.constant 0 : index
    %c0_2 = arith.constant 0 : index
    %c0_3 = arith.constant 0 : index
    %9 = vector.load %arg2[%c0, %c0_0, %c0_1, %c0_2, %c0_3] : memref<1x1x1x18x72xf32, #tpu.memory_space<vmem>>, vector<1x1x1x18x72xf32>
    %10 = vector.shape_cast %9 : vector<1x1x1x18x72xf32> to vector<18x72xf32>
    %c0_4 = arith.constant 0 : index
    %c0_5 = arith.constant 0 : index
    %11 = vector.load %arg5[%c0_4, %c0_5] : memref<2x72xf32, #tpu.memory_space<vmem>>, vector<1x72xf32>
    %12 = vector.broadcast %11 : vector<1x72xf32> to vector<18x72xf32>
    %13 = arith.mulf %10, %12 : vector<18x72xf32>
    %c1 = arith.constant 1 : index
    %c0_6 = arith.constant 0 : index
    %14 = vector.load %arg5[%c1, %c0_6] : memref<2x72xf32, #tpu.memory_space<vmem>>, vector<1x72xf32>
    %15 = vector.broadcast %14 : vector<1x72xf32> to vector<18x72xf32>
    %16 = arith.addf %13, %15 : vector<18x72xf32>
    %cst = arith.constant 0.000000e+00 : f32
    %17 = vector.broadcast %cst : f32 to vector<18x72xf32>
    %18 = arith.maximumf %16, %17 : vector<18x72xf32>
    %cst_7 = arith.constant 0.000000e+00 : f32
    %19 = vector.shape_cast %8 : vector<18x1xi1> to vector<18x1xi1>
    %20 = vector.broadcast %19 : vector<18x1xi1> to vector<18x72xi1>
    %21 = vector.broadcast %cst_7 : f32 to vector<18x72xf32>
    %22 = arith.select %20, %18, %21 : vector<18x72xi1>, vector<18x72xf32>
    %23 = vector.extract_strided_slice %22 {offsets = [0, 0], sizes = [18, 64], strides = [1, 1]} : vector<18x72xf32> to vector<18x64xf32>
    %24 = vector.extract_strided_slice %22 {offsets = [0, 4], sizes = [18, 64], strides = [1, 1]} : vector<18x72xf32> to vector<18x64xf32>
    %25 = vector.extract_strided_slice %22 {offsets = [0, 8], sizes = [18, 64], strides = [1, 1]} : vector<18x72xf32> to vector<18x64xf32>
    %26 = vector.extract_strided_slice %23 {offsets = [0, 0], sizes = [16, 64], strides = [1, 1]} : vector<18x64xf32> to vector<16x64xf32>
    %c0_8 = arith.constant 0 : index
    %c0_9 = arith.constant 0 : index
    %27 = vector.load %arg3[%c0_8, %c0_9] : memref<9x64xf32, #tpu.memory_space<vmem>>, vector<1x64xf32>
    %28 = vector.broadcast %27 : vector<1x64xf32> to vector<16x64xf32>
    %29 = arith.mulf %26, %28 : vector<16x64xf32>
    %30 = vector.extract_strided_slice %24 {offsets = [0, 0], sizes = [16, 64], strides = [1, 1]} : vector<18x64xf32> to vector<16x64xf32>
    %c1_10 = arith.constant 1 : index
    %c0_11 = arith.constant 0 : index
    %31 = vector.load %arg3[%c1_10, %c0_11] : memref<9x64xf32, #tpu.memory_space<vmem>>, vector<1x64xf32>
    %32 = vector.broadcast %31 : vector<1x64xf32> to vector<16x64xf32>
    %33 = arith.mulf %30, %32 : vector<16x64xf32>
    %34 = arith.addf %29, %33 : vector<16x64xf32>
    %35 = vector.extract_strided_slice %25 {offsets = [0, 0], sizes = [16, 64], strides = [1, 1]} : vector<18x64xf32> to vector<16x64xf32>
    %c2 = arith.constant 2 : index
    %c0_12 = arith.constant 0 : index
    %36 = vector.load %arg3[%c2, %c0_12] : memref<9x64xf32, #tpu.memory_space<vmem>>, vector<1x64xf32>
    %37 = vector.broadcast %36 : vector<1x64xf32> to vector<16x64xf32>
    %38 = arith.mulf %35, %37 : vector<16x64xf32>
    %39 = arith.addf %34, %38 : vector<16x64xf32>
    %40 = vector.extract_strided_slice %23 {offsets = [1, 0], sizes = [16, 64], strides = [1, 1]} : vector<18x64xf32> to vector<16x64xf32>
    %c3 = arith.constant 3 : index
    %c0_13 = arith.constant 0 : index
    %41 = vector.load %arg3[%c3, %c0_13] : memref<9x64xf32, #tpu.memory_space<vmem>>, vector<1x64xf32>
    %42 = vector.broadcast %41 : vector<1x64xf32> to vector<16x64xf32>
    %43 = arith.mulf %40, %42 : vector<16x64xf32>
    %44 = vector.extract_strided_slice %24 {offsets = [1, 0], sizes = [16, 64], strides = [1, 1]} : vector<18x64xf32> to vector<16x64xf32>
    %c4 = arith.constant 4 : index
    %c0_14 = arith.constant 0 : index
    %45 = vector.load %arg3[%c4, %c0_14] : memref<9x64xf32, #tpu.memory_space<vmem>>, vector<1x64xf32>
    %46 = vector.broadcast %45 : vector<1x64xf32> to vector<16x64xf32>
    %47 = arith.mulf %44, %46 : vector<16x64xf32>
    %48 = arith.addf %43, %47 : vector<16x64xf32>
    %49 = vector.extract_strided_slice %25 {offsets = [1, 0], sizes = [16, 64], strides = [1, 1]} : vector<18x64xf32> to vector<16x64xf32>
    %c5 = arith.constant 5 : index
    %c0_15 = arith.constant 0 : index
    %50 = vector.load %arg3[%c5, %c0_15] : memref<9x64xf32, #tpu.memory_space<vmem>>, vector<1x64xf32>
    %51 = vector.broadcast %50 : vector<1x64xf32> to vector<16x64xf32>
    %52 = arith.mulf %49, %51 : vector<16x64xf32>
    %53 = arith.addf %48, %52 : vector<16x64xf32>
    %54 = vector.extract_strided_slice %23 {offsets = [2, 0], sizes = [16, 64], strides = [1, 1]} : vector<18x64xf32> to vector<16x64xf32>
    %c6 = arith.constant 6 : index
    %c0_16 = arith.constant 0 : index
    %55 = vector.load %arg3[%c6, %c0_16] : memref<9x64xf32, #tpu.memory_space<vmem>>, vector<1x64xf32>
    %56 = vector.broadcast %55 : vector<1x64xf32> to vector<16x64xf32>
    %57 = arith.mulf %54, %56 : vector<16x64xf32>
    %58 = vector.extract_strided_slice %24 {offsets = [2, 0], sizes = [16, 64], strides = [1, 1]} : vector<18x64xf32> to vector<16x64xf32>
    %c7 = arith.constant 7 : index
    %c0_17 = arith.constant 0 : index
    %59 = vector.load %arg3[%c7, %c0_17] : memref<9x64xf32, #tpu.memory_space<vmem>>, vector<1x64xf32>
    %60 = vector.broadcast %59 : vector<1x64xf32> to vector<16x64xf32>
    %61 = arith.mulf %58, %60 : vector<16x64xf32>
    %62 = arith.addf %57, %61 : vector<16x64xf32>
    %63 = vector.extract_strided_slice %25 {offsets = [2, 0], sizes = [16, 64], strides = [1, 1]} : vector<18x64xf32> to vector<16x64xf32>
    %c8 = arith.constant 8 : index
    %c0_18 = arith.constant 0 : index
    %64 = vector.load %arg3[%c8, %c0_18] : memref<9x64xf32, #tpu.memory_space<vmem>>, vector<1x64xf32>
    %65 = vector.broadcast %64 : vector<1x64xf32> to vector<16x64xf32>
    %66 = arith.mulf %63, %65 : vector<16x64xf32>
    %67 = arith.addf %62, %66 : vector<16x64xf32>
    %68 = arith.addf %39, %53 : vector<16x64xf32>
    %69 = arith.addf %68, %67 : vector<16x64xf32>
    %c0_19 = arith.constant 0 : index
    %c0_20 = arith.constant 0 : index
    %70 = vector.load %arg4[%c0_19, %c0_20] : memref<64x128xf32, #tpu.memory_space<vmem>>, vector<64x128xf32>
    %cst_21 = arith.constant dense<0.000000e+00> : vector<16x128xf32>
    %71 = tpu.matmul %69, %70, %cst_21 {dimension_numbers = #tpu.dot_dimension_numbers<[1], [0], [0], [1], [0, 0, 1, 1], [], []>} : vector<16x64xf32>, vector<64x128xf32>, vector<16x128xf32> -> vector<16x128xf32>
    %c0_22 = arith.constant 0 : index
    %c0_23 = arith.constant 0 : index
    %c0_24 = arith.constant 0 : index
    %72 = vector.load %arg6[%c0_22, %c0_23, %c0_24] : memref<1x16x128xf32, #tpu.memory_space<vmem>>, vector<1x16x128xf32>
    %73 = vector.shape_cast %72 : vector<1x16x128xf32> to vector<16x128xf32>
    %74 = vector.shape_cast %71 : vector<16x128xf32> to vector<1x16x128xf32>
    tpu.vector_store %arg6[%c0_22, %c0_23, %c0_24], %74 {strides = array<i32>} : memref<1x16x128xf32, #tpu.memory_space<vmem>>, vector<1x16x128xf32>,
    %cst_25 = arith.constant dense<0.000000e+00> : vector<128xf32>
    %75 = vector.multi_reduction <add>, %71, %cst_25 [0] : vector<16x128xf32> to vector<128xf32>
    %76 = vector.shape_cast %75 : vector<128xf32> to vector<1x128xf32>
    %c0_26 = arith.constant 0 : index
    %c0_27 = arith.constant 0 : index
    %c0_28 = arith.constant 0 : index
    %c0_29 = arith.constant 0 : index
    %77 = vector.load %arg7[%c0_26, %c0_27, %c0_28, %c0_29] : memref<1x1x2x128xf32, #tpu.memory_space<vmem>>, vector<1x1x1x128xf32>
    %78 = vector.shape_cast %77 : vector<1x1x1x128xf32> to vector<1x128xf32>
    %79 = vector.shape_cast %76 : vector<1x128xf32> to vector<1x1x1x128xf32>
    tpu.vector_store %arg7[%c0_26, %c0_27, %c0_28, %c0_29], %79 {strides = array<i32>} : memref<1x1x2x128xf32, #tpu.memory_space<vmem>>, vector<1x1x1x128xf32>,
    %80 = arith.mulf %71, %71 : vector<16x128xf32>
    %cst_30 = arith.constant dense<0.000000e+00> : vector<128xf32>
    %81 = vector.multi_reduction <add>, %80, %cst_30 [0] : vector<16x128xf32> to vector<128xf32>
    %82 = vector.shape_cast %81 : vector<128xf32> to vector<1x128xf32>
    %c0_31 = arith.constant 0 : index
    %c0_32 = arith.constant 0 : index
    %c1_33 = arith.constant 1 : index
    %c0_34 = arith.constant 0 : index
    %83 = vector.load %arg7[%c0_31, %c0_32, %c1_33, %c0_34] : memref<1x1x2x128xf32, #tpu.memory_space<vmem>>, vector<1x1x1x128xf32>
    %84 = vector.shape_cast %83 : vector<1x1x1x128xf32> to vector<1x128xf32>
    %85 = vector.shape_cast %82 : vector<1x128xf32> to vector<1x1x1x128xf32>
    tpu.vector_store %arg7[%c0_31, %c0_32, %c1_33, %c0_34], %85 {strides = array<i32>} : memref<1x1x2x128xf32, #tpu.memory_space<vmem>>, vector<1x1x1x128xf32>,
    return
  }
  func.func @transform_0(%arg0: i32, %arg1: i32) -> (i32, i32, i32, i32, i32) {
    %c0_i32 = arith.constant 0 : i32
    %c0_i32_0 = arith.constant 0 : i32
    %c0_i32_1 = arith.constant 0 : i32
    %c0_i32_2 = arith.constant 0 : i32
    return %arg0, %arg1, %c0_i32, %c0_i32_0, %c0_i32_1 : i32, i32, i32, i32, i32
  }
  func.func @transform_1(%arg0: i32, %arg1: i32) -> (i32, i32) {
    %c0_i32 = arith.constant 0 : i32
    %c0_i32_0 = arith.constant 0 : i32
    %c0_i32_1 = arith.constant 0 : i32
    return %c0_i32, %c0_i32_0 : i32, i32
  }
  func.func @transform_2(%arg0: i32, %arg1: i32) -> (i32, i32) {
    %c0_i32 = arith.constant 0 : i32
    %c0_i32_0 = arith.constant 0 : i32
    %c0_i32_1 = arith.constant 0 : i32
    return %c0_i32, %c0_i32_0 : i32, i32
  }
  func.func @transform_3(%arg0: i32, %arg1: i32) -> (i32, i32) {
    %c0_i32 = arith.constant 0 : i32
    %c0_i32_0 = arith.constant 0 : i32
    %c0_i32_1 = arith.constant 0 : i32
    return %c0_i32, %c0_i32_0 : i32, i32
  }
  func.func @transform_4(%arg0: i32, %arg1: i32) -> (i32, i32, i32) {
    %c0_i32 = arith.constant 0 : i32
    %c0_i32_0 = arith.constant 0 : i32
    return %arg0, %arg1, %c0_i32 : i32, i32, i32
  }
  func.func @transform_5(%arg0: i32, %arg1: i32) -> (i32, i32, i32, i32) {
    %c0_i32 = arith.constant 0 : i32
    %c0_i32_0 = arith.constant 0 : i32
    %c0_i32_1 = arith.constant 0 : i32
    return %arg0, %arg1, %c0_i32, %c0_i32_0 : i32, i32, i32, i32
  }
}

</mosaic_0001>

<bundles_post_ra>
// kernel: tile.84
= control target key start
LH: loop header
LB: loop body
LE: loop exit
PB: predicated region body
PF: predicated region fallthrough
CT: control target
= control target key end

     0   :  { %s28_s0 = inlined_call_operand.vmem [shape: f32[4], index: 0, kind: input, shape index: {}]   ;;  %s29_s1 = inlined_call_operand.vmem [shape: f32[16,4], index: 1, kind: output, shape index: {}]  }
   0x1   :  { %v4_v0 = vld [vmem:[%s28_s0] ss:$0 sm:$0xff] }
   0x2   :  { %5 = vst [vmem:[%s29_s1] sm:$0xff] %v4_v0  ;;  %8 = vst [vmem:[%s29_s1 + $0x8] sm:$0xff] %v4_v0 }

// kernel: tile.109
= control target key start
LH: loop header
LB: loop body
LE: loop exit
PB: predicated region body
PF: predicated region fallthrough
CT: control target
= control target key end

     0   :  { %s133_s10 = smov 60   ;;  %s134_s11 = smov 52   ;;  %vm3_vm0 = vcmask 31744   ;;  %vm9_vm1 = vcmask 523744   ;;  %vm15_vm2 = vcmask 490944   ;;  %vm21_vm3 = vcmask 458144   ;;  %s209_s0 = inlined_call_operand.vmem [shape: f32[16,4], index: 0, kind: input, shape index: {}]   ;;  %s210_s1 = inlined_call_operand.vmem [shape: f32[1,64], index: 1, kind: output, shape index: {}]  }
   0x1   :  { %v103_v0 = vld [vmem:[%s209_s0 + $0xf] sm:$0x1]   ;;  %v105_v1 = vld [vmem:[%s209_s0 + $0xd] sm:$0x1]   ;;  %v104_v2 = vld [vmem:[%s209_s0 + $0xe] sm:$0x1]  }
   0x2   :  { %7 = vrot.lane.b32.xlu0 %v103_v0, %s133_s10  ;;  %19 = vrot.lane.b32.xlu1 %v105_v1, %s134_s11  ;;  %v106_v3 = vld [vmem:[%s209_s0 + $0xc] sm:$0x1]   ;;  %s135_s16 = smov 56   ;;  %s136_s17 = smov 48   ;;  %v107_v4 = vld [vmem:[%s209_s0 + $0xb] sm:$0x1]  }
   0x3   :  { %v108_v5 = vld [vmem:[%s209_s0 + $0xa] sm:$0x1]   ;;  %v2_v6 = vld [vmem:[%s209_s0] sm:$0x1]   ;;  %s137_s24 = smov 44   ;;  %s138_s25 = smov 40  }
   0x4   :  { %4 = vst.msk [vmem:[#allocation0] sm:$0x1] %vm3_vm0, %v2_v6   ;;  %v109_v7 = vld [vmem:[%s209_s0 + $0x9] sm:$0x1]   ;;  %v110_v8 = vld [vmem:[%s209_s0 + $0x8] sm:$0x1]  }
   0x5   :  { %s139_s30 = smov 36   ;;  %s140_s2 = smov 32   ;;  %v111_v9 = vld [vmem:[%s209_s0 + $0x7] sm:$0x1]   ;;  %v112_v10 = vld [vmem:[%s209_s0 + $0x6] sm:$0x1]  }
   0x6   :  { %13 = vrot.lane.b32.xlu0 %v104_v2, %s135_s16  ;;  %25 = vrot.lane.b32.xlu1 %v106_v3, %s136_s17  ;;  %s141_s7 = smov 28   ;;  %s142_s8 = smov 24   ;;  %v113_v11 = vld [vmem:[%s209_s0 + $0x5] sm:$0x1]   ;;  %v114_v12 = vld [vmem:[%s209_s0 + $0x4] sm:$0x1]  }
   0x7   :  { %s143_s13 = smov 20   ;;  %s144_s14 = smov 16   ;;  %v115_v13 = vld [vmem:[%s209_s0 + $0x3] sm:$0x1]   ;;  %v116_v14 = vld [vmem:[%s209_s0 + $0x2] sm:$0x1]  }
   0x8   :  { %s145_s19 = smov 12   ;;  %s146_s20 = smov 8   ;;  %v117_v15 = vld [vmem:[%s209_s0 + $0x1] sm:$0x1]   ;;  %vm27_vm4 = vcmask 425344   ;;  %vm33_vm5 = vcmask 392544  }
   0x9   :  { %s147_s0 = smov 4   ;;  %vm39_vm6 = vcmask 359744   ;;  %vm45_vm7 = vcmask 326944   ;;  %vm51_vm8 = vcmask 294144   ;;  %vm57_vm9 = vcmask 261344  }
   0xa   :  { %31 = vrot.lane.b32.xlu0 %v107_v4, %s137_s24  ;;  %37 = vrot.lane.b32.xlu1 %v108_v5, %s138_s25  ;;  %vm63_vm10 = vcmask 228544   ;;  %vm69_vm11 = vcmask 195744   ;;  %vm75_vm12 = vcmask 162944   ;;  %vm81_vm13 = vcmask 130144  }
   0xb   :  { %vm87_vm14 = vcmask 97344   ;;  %vm93_vm15 = vcmask 64544  }
   0xe   :  { %43 = vrot.lane.b32.xlu0 %v109_v7, %s139_s30  ;;  %49 = vrot.lane.b32.xlu1 %v110_v8, %s140_s2 }
  0x12   :  { %55 = vrot.lane.b32.xlu0 %v111_v9, %s141_s7  ;;  %61 = vrot.lane.b32.xlu1 %v112_v10, %s142_s8 }
  0x16   :  { %67 = vrot.lane.b32.xlu0 %v113_v11, %s143_s13  ;;  %73 = vrot.lane.b32.xlu1 %v114_v12, %s144_s14 }
  0x1a   :  { %79 = vrot.lane.b32.xlu0 %v115_v13, %s145_s19  ;;  %85 = vrot.lane.b32.xlu1 %v116_v14, %s146_s20 }
  0x1e   :  { %91 = vrot.lane.b32.xlu0 %v117_v15, %s147_s0 }
  0x74   :  { %v8_v16 = vpop.permute.xlu0 %7   ;;  %v20_v17 = vpop.permute.xlu1 %19  }
  0x75   :  { %10 = vst.msk [vmem:[#allocation0] sm:$0x1] %vm9_vm1, %v8_v16  }
  0x78   :  { %v14_v18 = vpop.permute.xlu0 %13   ;;  %v26_v19 = vpop.permute.xlu1 %25  }
  0x79   :  { %16 = vst.msk [vmem:[#allocation0] sm:$0x1] %vm15_vm2, %v14_v18  }
  0x7a   :  { %22 = vst.msk [vmem:[#allocation0] sm:$0x1] %vm21_vm3, %v20_v17  }
  0x7b   :  { %28 = vst.msk [vmem:[#allocation0] sm:$0x1] %vm27_vm4, %v26_v19  }
  0x7c   :  { %v32_v20 = vpop.permute.xlu0 %31   ;;  %v38_v21 = vpop.permute.xlu1 %37  }
  0x7d   :  { %34 = vst.msk [vmem:[#allocation0] sm:$0x1] %vm33_vm5, %v32_v20  }
  0x7e   :  { %40 = vst.msk [vmem:[#allocation0] sm:$0x1] %vm39_vm6, %v38_v21  }
  0x80   :  { %v44_v22 = vpop.permute.xlu0 %43   ;;  %v50_v23 = vpop.permute.xlu1 %49  }
  0x81   :  { %46 = vst.msk [vmem:[#allocation0] sm:$0x1] %vm45_vm7, %v44_v22  }
  0x82   :  { %52 = vst.msk [vmem:[#allocation0] sm:$0x1] %vm51_vm8, %v50_v23  }
  0x84   :  { %v56_v24 = vpop.permute.xlu0 %55   ;;  %v62_v25 = vpop.permute.xlu1 %61  }
  0x85   :  { %58 = vst.msk [vmem:[#allocation0] sm:$0x1] %vm57_vm9, %v56_v24  }
  0x86   :  { %64 = vst.msk [vmem:[#allocation0] sm:$0x1] %vm63_vm10, %v62_v25  }
  0x88   :  { %v68_v26 = vpop.permute.xlu0 %67   ;;  %v74_v27 = vpop.permute.xlu1 %73  }
  0x89   :  { %70 = vst.msk [vmem:[#allocation0] sm:$0x1] %vm69_vm11, %v68_v26  }
  0x8a   :  { %76 = vst.msk [vmem:[#allocation0] sm:$0x1] %vm75_vm12, %v74_v27  }
  0x8c   :  { %v80_v28 = vpop.permute.xlu0 %79   ;;  %v86_v29 = vpop.permute.xlu1 %85  }
  0x8d   :  { %82 = vst.msk [vmem:[#allocation0] sm:$0x1] %vm81_vm13, %v80_v28  }
  0x8e   :  { %88 = vst.msk [vmem:[#allocation0] sm:$0x1] %vm87_vm14, %v86_v29  }
  0x90   :  { %v92_v30 = vpop.permute.xlu0 %91  }
  0x91   :  { %94 = vst.msk [vmem:[#allocation0] sm:$0x1] %vm93_vm15, %v92_v30  }
  0x98   :  { %v99_v31 = vld [vmem:[#allocation0] sm:$0x1] }
  0x99   :  { %102 = vst [vmem:[%s210_s1] sm:$0x1] %v99_v31 }

// kernel: tile.157
= control target key start
LH: loop header
LB: loop body
LE: loop exit
PB: predicated region body
PF: predicated region fallthrough
CT: control target
= control target key end

     0   :  { %s34_s0 = inlined_call_operand.vmem [shape: f32[4], index: 0, kind: input, shape index: {}]   ;;  %s35_s1 = inlined_call_operand.vmem [shape: f32[18,4], index: 1, kind: output, shape index: {}]  }
   0x1   :  { %v4_v0 = vld [vmem:[%s34_s0] ss:$0 sm:$0xff] }
   0x2   :  { %5 = vst [vmem:[%s35_s1] sm:$0xff] %v4_v0  ;;  %10 = vst [vmem:[%s35_s1 + $0x8] sm:$0xff] %v4_v0 }
   0x3   :  { %11 = vst [vmem:[%s35_s1 + $0x10] sm:$0xff] %v4_v0 }

// kernel: sep_conv_forward.2
= control target key start
LH: loop header
LB: loop body
LE: loop exit
PB: predicated region body
PF: predicated region fallthrough
CT: control target
= control target key end

     0   :  { %s839_s15 = smov 0   ;;  %s841_s16 = smov 0   ;;  %s987_s0 = inlined_call_operand.vmem [shape: f32[2,1,1,18,72], index: 0, kind: input, shape index: {}]   ;;  %s988_s1 = inlined_call_operand.vmem [shape: f32[9,64], index: 1, kind: input, shape index: {}]   ;;  %s989_s2 = inlined_call_operand.vmem [shape: f32[64,64], index: 2, kind: input, shape index: {}]   ;;  %s990_s3 = inlined_call_operand.vmem [shape: f32[2,16,64], index: 3, kind: output, shape index: {0}]   ;;  %s991_s4 = inlined_call_operand.vmem [shape: f32[2,1,2,64], index: 4, kind: output, shape index: {1}]  }
   0x1   :  { %s843_s17 = smov 0  }
   0x2 LB: > { %s27_s18 = sadd.s32 1, %s804_s16  ;;  %p709_p0 = scmp.ge.s32.totalorder %s808_s17, 1  ;;  %s808_s17 = sphi %s843_s17, %s15_s17   ;;  %s804_s16 = sphi %s841_s16, %s993_s16   ;;  %s800_s15 = sphi %s839_s15, %s992_s15  }
   0x3   : > { %p29_p1 = scmp.ge.s32.totalorder %s27_s18, 2  ;;  %p187_p2 = scmp.lt.s32.totalorder %s808_s17, 3 }
   0x5   : > { %s995_s18 = smov (%p29_p1, %s27_s18), 0  ;;  %p188_p3 = pnand %p709_p0, %p187_p2 }
   0x6   : > { %s810_s21 = smov (!%p188_p3), 4   ;;  %s811_s28 = smov (!%p188_p3), 8  }
   0x7   : > { %191 = sbr.rel (%p188_p3) target bundleno = 493 (0x1ed), region = 32  ;;  %p228_p4 = scmp.lt.s32.totalorder (!%p188_p3), %s800_s15, 1 }
   0x8   : > { %s812_s11 = smov (!%p188_p3), 124   ;;  %s813_s12 = smov (!%p188_p3), 120  }
   0xc   : > { %v718_v0 = vld [vmem:[%s988_s1 + $0x4] ss:$0 sm:$0xff]  ;;  %v721_v1 = vld [vmem:[%s988_s1 + $0x7] ss:$0 sm:$0xff]  ;;  %v719_v2 = vld [vmem:[%s988_s1 + $0x5] ss:$0 sm:$0xff] }
   0xd   : > { %323 = vrot.lane.b32.xlu0 %v718_v0, %s810_s21  ;;  %385 = vrot.lane.b32.xlu1 %v721_v1, %s810_s21  ;;  %v715_v3 = vld [vmem:[%s988_s1 + $0x1] ss:$0 sm:$0xff]  ;;  %v722_v4 = vld [vmem:[%s988_s1 + $0x8] ss:$0 sm:$0xff]  ;;  %s997_s15 = smov (!%p228_p4, %s800_s15), 1  ;;  %vm436_vm0 = vcmask 1046528  }
   0xe   : > { %v716_v5 = vld [vmem:[%s988_s1 + $0x2] ss:$0 sm:$0xff]  ;;  %s757_s7 = smul.u32 24, %s997_s15  ;;  %v466_v21 = vld [vmem:[%s989_s2 + $0x38] sm:$0xff]  ;;  %v465_v23 = vld [vmem:[%s989_s2 + $0x30] sm:$0xff]  ;;  %vm449_vm1 = vcmask 1045504  }
   0xf   : > { %738 = vmatprep.subr.mxu0 %v466_v21  ;;  %v464_v25 = vld [vmem:[%s989_s2 + $0x28] sm:$0xff]  ;;  %v463_v27 = vld [vmem:[%s989_s2 + $0x20] sm:$0xff]  ;;  %v462_v31 = vld [vmem:[%s989_s2 + $0x18] sm:$0xff]  ;;  %vm467_vm2 = vcmask 523264   ;;  %s727_s13 = sshll.u32 %s997_s15, 4  ;;  %vm560_vm3 = vcmask 516096  }
  0x10   : > { %s236_s10 = scalar_lea.vmem %s987_s0, %s757_s7  ;;  %739 = vmatpush3.msra.mxu0 %v466_v21  ;;  %v461_v33 = vld [vmem:[%s989_s2 + $0x10] sm:$0xff]  ;;  %v460_v36 = vld [vmem:[%s989_s2 + $0x8] sm:$0xff]  ;;  %v459_v39 = vld [vmem:[%s989_s2] sm:$0xff]  ;;  %s245_s20 = scalar_lea.vmem %s990_s3, %s727_s13 }
  0x11   : > { %350 = vrot.lane.b32.xlu0 %v719_v2, %s811_s28  ;;  %273 = vrot.lane.b32.xlu1 %v715_v3, %s810_s21  ;;  %v254_v6 = vld [vmem:[%s236_s10] sm:$0xff]  ;;  %v255_v7 = vld [vmem:[%s236_s10 + $0x8] sm:$0xff]  ;;  %s713_s21 = sshll.u32 %s997_s15, 1 }
  0x12   : > { %v881_v8 = vmax.f32 %v254_v6, 0.0  ;;  %v883_v9 = vmax.f32 %v255_v7, 0.0  ;;  %v256_v10 = vld [vmem:[%s236_s10 + $0x10] sm:$0x3]  ;;  %740 = vmatprep.subr.mxu0 %v465_v23  ;;  %v717_v42 = vld [vmem:[%s988_s1 + $0x3] ss:$0 sm:$0xff]  ;;  %s253_s24 = scalar_lea.vmem %s991_s4, %s713_s21 }
  0x13   : > { %v885_v12 = vmax.f32 %v256_v10, 0.0  ;;  %741 = vmatpush3.msra.mxu0 %v465_v23  ;;  %v720_v61 = vld [vmem:[%s988_s1 + $0x6] ss:$0 sm:$0xff]  ;;  %v714_v63 = vld [vmem:[%s988_s1] ss:$0 sm:$0xff] }
  0x14   : > { %742 = vmatprep.subr.mxu0 %v464_v25  ;;  %v314_v45 = vmul.f32 %v717_v42, %v881_v8  ;;  %v315_v46 = vmul.f32 %v717_v42, %v883_v9  ;;  %v376_v2 = vmul.f32 %v720_v61, %v881_v8 }
  0x15   : > { %412 = vrot.lane.b32.xlu0 %v722_v4, %s811_s28  ;;  %294 = vrot.lane.b32.xlu1 %v716_v5, %s811_s28  ;;  %v316_v56 = vmul.f32 %v717_v42, %v885_v12  ;;  %v377_v4 = vmul.f32 %v720_v61, %v883_v9  ;;  %v265_v5 = vmul.f32 %v714_v63, %v881_v8 }
  0x16   : > { %743 = vmatpush3.msra.mxu0 %v464_v25 }
  0x17   : > { %744 = vmatprep.subr.mxu0 %v463_v27 }
  0x18   : > { %745 = vmatpush3.msra.mxu0 %v463_v27 }
  0x19   : > { %746 = vmatprep.subr.mxu0 %v462_v31 }
  0x1a   : > { %747 = vmatpush3.msra.mxu0 %v462_v31 }
  0x1b   : > { %748 = vmatprep.subr.mxu0 %v461_v33 }
  0x1c   : > { %749 = vmatpush3.msra.mxu0 %v461_v33 }
  0x1d   : > { %750 = vmatprep.subr.mxu0 %v460_v36 }
  0x1e   : > { %751 = vmatpush3.msra.mxu0 %v460_v36 }
  0x1f   : > { %752 = vmatprep.subr.mxu0 %v459_v39 }
  0x20   : > { %753 = vmatpush3.msra.mxu0 %v459_v39 }
  0x7f   : > { %v324_v11 = vpop.permute.xlu0 %323  ;;  %v386_v15 = vpop.permute.xlu1 %385 }
  0x80   : > { %v326_v13 = vmul.f32 %v324_v11, %v881_v8  ;;  %v327_v14 = vmul.f32 %v324_v11, %v883_v9  ;;  %v328_v17 = vmul.f32 %v324_v11, %v885_v12  ;;  %v388_v19 = vmul.f32 %v386_v15, %v881_v8 }
  0x81   : > { %v389_v26 = vmul.f32 %v386_v15, %v883_v9  ;;  %v390_v30 = vmul.f32 %v386_v15, %v885_v12 }
  0x82   : > { %334 = vrot.lane.b32.xlu1 %v327_v14, %s812_s11  ;;  %332 = vrot.lane.b32.xlu0 %v326_v13, %s812_s11  ;;  %v378_v14 = vmul.f32 %v720_v61, %v885_v12 }
  0x83   : > { %v351_v16 = vpop.permute.xlu0 %350  ;;  %v274_v20 = vpop.permute.xlu1 %273 }
  0x84   : > { %v353_v18 = vmul.f32 %v351_v16, %v881_v8  ;;  %v354_v22 = vmul.f32 %v351_v16, %v883_v9  ;;  %v276_v24 = vmul.f32 %v274_v20, %v881_v8  ;;  %v355_v29 = vmul.f32 %v351_v16, %v885_v12 }
  0x85   : > { %v277_v35 = vmul.f32 %v274_v20, %v883_v9 }
  0x86   : > { %359 = vrot.lane.b32.xlu1 %v353_v18, %s813_s12  ;;  %336 = vrot.lane.b32.xlu0 %v328_v17, %s812_s11  ;;  %v266_v17 = vmul.f32 %v714_v63, %v883_v9 }
  0x87   : > { %v413_v28 = vpop.permute.xlu0 %412  ;;  %v295_v34 = vpop.permute.xlu1 %294 }
  0x88   : > { %v415_v32 = vmul.f32 %v413_v28, %v881_v8  ;;  %v297_v37 = vmul.f32 %v295_v34, %v881_v8  ;;  %v416_v38 = vmul.f32 %v413_v28, %v883_v9  ;;  %v417_v40 = vmul.f32 %v413_v28, %v885_v12 }
  0x89   : > { %v298_v41 = vmul.f32 %v295_v34, %v883_v9 }
  0x8a   : > { %394 = vrot.lane.b32.xlu1 %v388_v19, %s812_s11  ;;  %361 = vrot.lane.b32.xlu0 %v354_v22, %s813_s12 }
  0x8e   : > { %396 = vrot.lane.b32.xlu0 %v389_v26, %s812_s11  ;;  %280 = vrot.lane.b32.xlu1 %v276_v24, %s812_s11 }
  0x92   : > { %363 = vrot.lane.b32.xlu0 %v355_v29, %s813_s12  ;;  %398 = vrot.lane.b32.xlu1 %v390_v30, %s812_s11 }
  0x96   : > { %282 = vrot.lane.b32.xlu0 %v277_v35, %s812_s11  ;;  %421 = vrot.lane.b32.xlu1 %v415_v32, %s813_s12 }
  0x9a   : > { %423 = vrot.lane.b32.xlu0 %v416_v38, %s813_s12  ;;  %301 = vrot.lane.b32.xlu1 %v297_v37, %s813_s12 }
  0x9e   : > { %425 = vrot.lane.b32.xlu0 %v417_v40, %s813_s12  ;;  %303 = vrot.lane.b32.xlu1 %v298_v41, %s813_s12 }
  0xf4   : > { %v335_v43 = vpop.permute.xlu1 %334  ;;  %v333_v44 = vpop.permute.xlu0 %332 }
  0xf5   : > { %v341_v49 = vadd.f32 %v333_v44, %v314_v45  ;;  %v342_v50 = vadd.f32 %v335_v43, %v315_v46 }
  0xf8   : > { %v360_v47 = vpop.permute.xlu1 %359  ;;  %v337_v48 = vpop.permute.xlu0 %336 }
  0xf9   : > { %v368_v51 = vadd.f32 %v360_v47, %v341_v49  ;;  %v343_v62 = vadd.f32 %v337_v48, %v316_v56 }
  0xfb   : > { %v437_v55 = vrot.slane %v368_v51, 1 }
  0xfc   : > { %v395_v52 = vpop.permute.xlu1 %394  ;;  %v362_v53 = vpop.permute.xlu0 %361 }
  0xfd   : > { %v369_v54 = vadd.f32 %v362_v53, %v342_v50  ;;  %v403_v11 = vadd.f32 %v395_v52, %v376_v2 }
  0xff   : > { %v438_v57 = vrot.slane %v369_v54, 1 }
 0x100   : > { %v397_v58 = vpop.permute.xlu0 %396  ;;  %v281_v59 = vpop.permute.xlu1 %280 }
 0x101   : > { %v439_v60 = vsel %vm436_vm0, %v437_v55, %v438_v57  ;;  %v404_v15 = vadd.f32 %v397_v58, %v377_v4  ;;  %v286_v16 = vadd.f32 %v281_v59, %v265_v5 }
 0x104   : > { %v364_v0 = vpop.permute.xlu0 %363  ;;  %v399_v1 = vpop.permute.xlu1 %398 }
 0x105   : > { %v370_v3 = vadd.f32 %v364_v0, %v343_v62  ;;  %v405_v23 = vadd.f32 %v399_v1, %v378_v14 }
 0x107   : > { %v440_v6 = vrot.slane %v370_v3, 1 }
 0x108   : > { %v283_v7 = vpop.permute.xlu0 %282  ;;  %v422_v10 = vpop.permute.xlu1 %421 }
 0x109   : > { %v441_v13 = vsel %vm436_vm0, %v438_v57, %v440_v6  ;;  %v430_v18 = vadd.f32 %v422_v10, %v403_v11  ;;  %v287_v8 = vadd.f32 %v283_v7, %v266_v17 }
 0x10b   : > { %v450_v24 = vrot.slane %v430_v18, 2 }
 0x10c   : > { %v424_v19 = vpop.permute.xlu0 %423  ;;  %v302_v20 = vpop.permute.xlu1 %301 }
 0x10d   : > { %v431_v21 = vadd.f32 %v424_v19, %v404_v15  ;;  %v307_v22 = vadd.f32 %v302_v20, %v286_v16 }
 0x10f   : > { %v451_v25 = vrot.slane %v431_v21, 2  ;;  %v444_v26 = vadd.f32 %v439_v60, %v307_v22 }
 0x110   : > { %v426_v27 = vpop.permute.xlu0 %425  ;;  %v304_v28 = vpop.permute.xlu1 %303 }
 0x111   : > { %v432_v29 = vadd.f32 %v426_v27, %v405_v23  ;;  %v308_v12 = vadd.f32 %v304_v28, %v287_v8  ;;  %v452_v30 = vsel %vm449_vm1, %v450_v24, %v451_v25 }
 0x112   : > { %v457_v31 = vadd.f32 %v452_v30, %v444_v26 }
 0x113   : > { %v453_v9 = vrot.slane %v432_v29, 2  ;;  %v445_v32 = vadd.f32 %v441_v13, %v308_v12 }
 0x114   : > { %754 = vmatprep.mubr.msk.f32.mxu0 %vm467_vm2, %v457_v31 }
 0x115   : > { %v454_v33 = vsel %vm449_vm1, %v451_v25, %v453_v9 }
 0x116   : > { %v458_v34 = vadd.f32 %v454_v33, %v445_v32 }
 0x118   : > { %755 = vmatmul.mubr.msk.f32.vlgmr.msra.gmra.mxu0 %vm467_vm2, %v458_v34 }
 0x1d8   : > { %v756_v35 = vpop.f32.mrf.mxu0 }
 0x1d9   : > { %550 = vst.msk [vmem:[%s245_s20 + $0x8] sm:$0xff] %vm467_vm2, %v756_v35  ;;  %v563_v36 = vmul.f32 %v756_v35, %v756_v35  ;;  %v552_v38 = vsel %vm467_vm2, %v756_v35, 0.0 }
 0x1da   : > { %v540_v37 = vpop.f32.mrf.mxu0 }
 0x1db   : > { %549 = vst.msk [vmem:[%s245_s20] sm:$0xff] %vm467_vm2, %v540_v37  ;;  %v551_v39 = vsel %vm467_vm2, %v540_v37, 0.0  ;;  %v562_v40 = vmul.f32 %v540_v37, %v540_v37  ;;  %v565_v42 = vsel %vm467_vm2, %v563_v36, 0.0 }
 0x1dc   : > { %v553_v41 = vadd.f32 %v552_v38, %v551_v39 }
 0x1dd   : > { %v564_v43 = vsel %vm467_vm2, %v562_v40, 0.0 }
 0x1de   : > { %v554_v44 = vrot.slane %v553_v41, 4  ;;  %v566_v45 = vadd.f32 %v565_v42, %v564_v43 }
 0x1e0   : > { %v555_v46 = vadd.f32 %v554_v44, %v553_v41  ;;  %v567_v47 = vrot.slane %v566_v45, 4 }
 0x1e2   : > { %v556_v48 = vrot.slane %v555_v46, 2  ;;  %v568_v49 = vadd.f32 %v567_v47, %v566_v45 }
 0x1e4   : > { %v557_v50 = vadd.f32 %v556_v48, %v555_v46  ;;  %v569_v51 = vrot.slane %v568_v49, 2 }
 0x1e6   : > { %v558_v52 = vrot.slane %v557_v50, 1  ;;  %v570_v53 = vadd.f32 %v569_v51, %v568_v49 }
 0x1e8   : > { %v559_v54 = vadd.f32 %v558_v52, %v557_v50  ;;  %v571_v55 = vrot.slane %v570_v53, 1 }
 0x1ea   : > { %561 = vst.msk [vmem:[%s253_s24] sm:$0x1] %vm560_vm3, %v559_v54  ;;  %v572_v56 = vadd.f32 %v571_v55, %v570_v53 }
 0x1ec   : > { %573 = vst.msk [vmem:[%s253_s24 + $0x1] sm:$0x1] %vm560_vm3, %v572_v56 }
 0x1ed PF: > { %s15_s17 = sadd.s32 1, %s808_s17   ;;  %s992_s15 = smov %s804_s16 }
 0x1ee   : > { %p12_p5 = scmp.ge.s32.totalorder %s15_s17, 4   ;;  %s993_s16 = smov %s995_s18 }
 0x1f0   :  { %14 = sbr.rel (!%p12_p5) target bundleno = 2 (0x2), region = 74 }

// kernel: sep_conv_forward.3
= control target key start
LH: loop header
LB: loop body
LE: loop exit
PB: predicated region body
PF: predicated region fallthrough
CT: control target
= control target key end

     0   :  { %s911_s18 = smov 0   ;;  %s913_s19 = smov 0   ;;  %s1057_s0 = inlined_call_operand.vmem [shape: f32[2,1,1,18,72], index: 0, kind: input, shape index: {}]   ;;  %s1058_s1 = inlined_call_operand.vmem [shape: f32[9,64], index: 1, kind: input, shape index: {}]   ;;  %s1059_s2 = inlined_call_operand.vmem [shape: f32[64,128], index: 2, kind: input, shape index: {}]   ;;  %s1060_s3 = inlined_call_operand.vmem [shape: f32[2,72], index: 3, kind: input, shape index: {}]   ;;  %s1061_s4 = inlined_call_operand.vmem [shape: f32[2,16,128], index: 4, kind: output, shape index: {0}]   ;;  %s1062_s5 = inlined_call_operand.vmem [shape: f32[2,1,2,128], index: 5, kind: output, shape index: {1}]  }
   0x1   :  { %s915_s20 = smov 0  }
   0x2 LB: > { %s28_s21 = sadd.s32 1, %s871_s19  ;;  %p774_p0 = scmp.ge.s32.totalorder %s875_s20, 1  ;;  %s875_s20 = sphi %s915_s20, %s16_s20   ;;  %s871_s19 = sphi %s913_s19, %s1064_s19   ;;  %s867_s18 = sphi %s911_s18, %s1063_s18  }
   0x3   : > { %p30_p1 = scmp.ge.s32.totalorder %s28_s21, 2  ;;  %p212_p2 = scmp.lt.s32.totalorder %s875_s20, 3 }
   0x5   : > { %s1066_s21 = smov (%p30_p1, %s28_s21), 0  ;;  %p213_p3 = pnand %p774_p0, %p212_p2 }
   0x6   : > { %s877_s24 = smov (!%p213_p3), 4   ;;  %s878_s6 = smov (!%p213_p3), 8  }
   0x7   : > { %216 = sbr.rel (%p213_p3) target bundleno = 492 (0x1ec), region = 36  ;;  %p255_p4 = scmp.lt.s32.totalorder (!%p213_p3), %s867_s18, 1 }
   0x8   : > { %s879_s23 = smov (!%p213_p3), 124  }
   0xc   : > { %v785_v0 = vld [vmem:[%s1058_s1 + $0x4] ss:$0 sm:$0xff]  ;;  %v788_v1 = vld [vmem:[%s1058_s1 + $0x7] ss:$0 sm:$0xff]  ;;  %v786_v2 = vld [vmem:[%s1058_s1 + $0x5] ss:$0 sm:$0xff]  ;;  %v282_v10 = vlaneseq }
   0xd   : > { %393 = vrot.lane.b32.xlu0 %v785_v0, %s877_s24  ;;  %455 = vrot.lane.b32.xlu1 %v788_v1, %s877_s24  ;;  %v782_v3 = vld [vmem:[%s1058_s1 + $0x1] ss:$0 sm:$0xff]  ;;  %v789_v4 = vld [vmem:[%s1058_s1 + $0x8] ss:$0 sm:$0xff]  ;;  %s1068_s18 = smov (!%p255_p4, %s867_s18), 1  ;;  %vm506_vm2 = vcmask 1046528  }
   0xe   : > { %v783_v5 = vld [vmem:[%s1058_s1 + $0x2] ss:$0 sm:$0xff]  ;;  %s824_s11 = smul.u32 24, %s1068_s18  ;;  %v779_v7 = vld [vmem:[%s1060_s3] ss:$0 sm:$0xff]  ;;  %v283_v16 = vshrl.u32 %v282_v10, 7 }
   0xf   : > { %v780_v12 = vld [vmem:[%s1060_s3 + $0x1] ss:$0 sm:$0xff]  ;;  %v536_v34 = vld [vmem:[%s1059_s2 + $0x38] sm:$0xff]  ;;  %v535_v36 = vld [vmem:[%s1059_s2 + $0x30] sm:$0xff]  ;;  %vm519_vm3 = vcmask 1045504   ;;  %vm537_vm4 = vcmask 523264  }
  0x10   : > { %s263_s14 = scalar_lea.vmem %s1057_s0, %s824_s11  ;;  %v285_v20 = vadd.s32 16, %v283_v16  ;;  %vm290_vm0 = vcmp.ge.s32.totalorder %v283_v16, 1  ;;  %805 = vmatprep.subr.mxu0 %v536_v34  ;;  %v534_v38 = vld [vmem:[%s1059_s2 + $0x28] sm:$0xff]  ;;  %v533_v40 = vld [vmem:[%s1059_s2 + $0x20] sm:$0xff]  ;;  %v532_v44 = vld [vmem:[%s1059_s2 + $0x18] sm:$0xff]  ;;  %s794_s26 = sshll.u32 %s1068_s18, 4 }
  0x11   : > { %420 = vrot.lane.b32.xlu0 %v786_v2, %s878_s6  ;;  %343 = vrot.lane.b32.xlu1 %v782_v3, %s877_s24  ;;  %v299_v6 = vld [vmem:[%s263_s14] sm:$0xff]  ;;  %v300_v8 = vld [vmem:[%s263_s14 + $0x8] sm:$0xff]  ;;  %s880_s24 = smov 120   ;;  %s272_s29 = scalar_lea.vmem %s1061_s4, %s794_s26 }
  0x12   : > { %v307_v9 = vmul.f32 %v779_v7, %v299_v6  ;;  %v301_v11 = vld [vmem:[%s263_s14 + $0x10] sm:$0x3]  ;;  %v308_v13 = vmul.f32 %v779_v7, %v300_v8  ;;  %vm295_vm1 = vcmp.lt.s32.totalorder %v285_v20, 17  ;;  %806 = vmatpush3.msra.mxu0 %v536_v34  ;;  %v530_v49 = vld [vmem:[%s1059_s2 + $0x8] sm:$0xff]  ;;  %v529_v52 = vld [vmem:[%s1059_s2] sm:$0xff]  ;;  %s778_s30 = sshll.u32 %s1068_s18, 1 }
  0x13   : > { %v309_v14 = vmul.f32 %v779_v7, %v301_v11  ;;  %807 = vmatprep.subr.mxu0 %v535_v36  ;;  %v531_v46 = vld [vmem:[%s1059_s2 + $0x10] sm:$0xff]  ;;  %v784_v55 = vld [vmem:[%s1058_s1 + $0x3] ss:$0 sm:$0xff]  ;;  %v787_v10 = vld [vmem:[%s1058_s1 + $0x6] ss:$0 sm:$0xff]  ;;  %s280_s8 = scalar_lea.vmem %s1062_s5, %s778_s30 }
  0x14   : > { %v315_v15 = vadd.f32 %v780_v12, %v307_v9  ;;  %v316_v17 = vadd.f32 %v780_v12, %v308_v13  ;;  %808 = vmatpush3.msra.mxu0 %v535_v36 }
  0x15   : > { %482 = vrot.lane.b32.xlu0 %v789_v4, %s878_s6  ;;  %364 = vrot.lane.b32.xlu1 %v783_v5, %s878_s6  ;;  %v317_v18 = vadd.f32 %v780_v12, %v309_v14  ;;  %v781_v12 = vld [vmem:[%s1058_s1] ss:$0 sm:$0xff] }
  0x16   : > { %v318_v19 = vmax.f32 %v315_v15, 0.0  ;;  %v959_v21 = vmax.f32 %v316_v17, 0.0  ;;  %809 = vmatprep.subr.mxu0 %v534_v38 }
  0x17   : > { %v320_v22 = vmax.f32 %v317_v18, 0.0  ;;  %810 = vmatpush3.msra.mxu0 %v534_v38 }
  0x18   : > { %v961_v23 = vsel %vm290_vm0, %v318_v19, 0.0  ;;  %811 = vmatprep.subr.mxu0 %v533_v40  ;;  %v385_v59 = vmul.f32 %v784_v55, %v959_v21  ;;  %v447_v17 = vmul.f32 %v787_v10, %v959_v21 }
  0x19   : > { %v965_v27 = vsel %vm295_vm1, %v320_v22, 0.0  ;;  %812 = vmatpush3.msra.mxu0 %v533_v40  ;;  %v384_v58 = vmul.f32 %v784_v55, %v961_v23  ;;  %v446_v15 = vmul.f32 %v787_v10, %v961_v23  ;;  %v335_v18 = vmul.f32 %v781_v12, %v961_v23 }
  0x1a   : > { %813 = vmatprep.subr.mxu0 %v532_v44  ;;  %v386_v5 = vmul.f32 %v784_v55, %v965_v27 }
  0x1b   : > { %814 = vmatpush3.msra.mxu0 %v532_v44 }
  0x1c   : > { %815 = vmatprep.subr.mxu0 %v531_v46 }
  0x1d   : > { %816 = vmatpush3.msra.mxu0 %v531_v46 }
  0x1e   : > { %817 = vmatprep.subr.mxu0 %v530_v49 }
  0x1f   : > { %818 = vmatpush3.msra.mxu0 %v530_v49 }
  0x20   : > { %819 = vmatprep.subr.mxu0 %v529_v52 }
  0x21   : > { %820 = vmatpush3.msra.mxu0 %v529_v52 }
  0x7f   : > { %v394_v24 = vpop.permute.xlu0 %393  ;;  %v456_v28 = vpop.permute.xlu1 %455 }
  0x80   : > { %v396_v25 = vmul.f32 %v394_v24, %v961_v23  ;;  %v397_v26 = vmul.f32 %v394_v24, %v959_v21  ;;  %v398_v30 = vmul.f32 %v394_v24, %v965_v27  ;;  %v458_v32 = vmul.f32 %v456_v28, %v961_v23 }
  0x81   : > { %v459_v39 = vmul.f32 %v456_v28, %v959_v21  ;;  %v460_v43 = vmul.f32 %v456_v28, %v965_v27 }
  0x82   : > { %404 = vrot.lane.b32.xlu1 %v397_v26, %s879_s23  ;;  %402 = vrot.lane.b32.xlu0 %v396_v25, %s879_s23  ;;  %v448_v26 = vmul.f32 %v787_v10, %v965_v27 }
  0x83   : > { %v421_v29 = vpop.permute.xlu0 %420  ;;  %v344_v33 = vpop.permute.xlu1 %343 }
  0x84   : > { %v423_v31 = vmul.f32 %v421_v29, %v961_v23  ;;  %v424_v35 = vmul.f32 %v421_v29, %v959_v21  ;;  %v346_v37 = vmul.f32 %v344_v33, %v961_v23  ;;  %v425_v42 = vmul.f32 %v421_v29, %v965_v27 }
  0x85   : > { %v347_v48 = vmul.f32 %v344_v33, %v959_v21 }
  0x86   : > { %429 = vrot.lane.b32.xlu1 %v423_v31, %s880_s24  ;;  %406 = vrot.lane.b32.xlu0 %v398_v30, %s879_s23  ;;  %v336_v30 = vmul.f32 %v781_v12, %v959_v21 }
  0x87   : > { %v483_v41 = vpop.permute.xlu0 %482  ;;  %v365_v47 = vpop.permute.xlu1 %364 }
  0x88   : > { %v485_v45 = vmul.f32 %v483_v41, %v961_v23  ;;  %v367_v50 = vmul.f32 %v365_v47, %v961_v23  ;;  %v486_v51 = vmul.f32 %v483_v41, %v959_v21  ;;  %v487_v53 = vmul.f32 %v483_v41, %v965_v27 }
  0x89   : > { %v368_v54 = vmul.f32 %v365_v47, %v959_v21 }
  0x8a   : > { %464 = vrot.lane.b32.xlu1 %v458_v32, %s879_s23  ;;  %431 = vrot.lane.b32.xlu0 %v424_v35, %s880_s24 }
  0x8e   : > { %466 = vrot.lane.b32.xlu0 %v459_v39, %s879_s23  ;;  %350 = vrot.lane.b32.xlu1 %v346_v37, %s879_s23 }
  0x92   : > { %433 = vrot.lane.b32.xlu0 %v425_v42, %s880_s24  ;;  %468 = vrot.lane.b32.xlu1 %v460_v43, %s879_s23 }
  0x96   : > { %352 = vrot.lane.b32.xlu0 %v347_v48, %s879_s23  ;;  %491 = vrot.lane.b32.xlu1 %v485_v45, %s880_s24 }
  0x9a   : > { %493 = vrot.lane.b32.xlu0 %v486_v51, %s880_s24  ;;  %371 = vrot.lane.b32.xlu1 %v367_v50, %s880_s24 }
  0x9e   : > { %495 = vrot.lane.b32.xlu0 %v487_v53, %s880_s24  ;;  %373 = vrot.lane.b32.xlu1 %v368_v54, %s880_s24 }
  0xf4   : > { %v405_v56 = vpop.permute.xlu1 %404  ;;  %v403_v57 = vpop.permute.xlu0 %402 }
  0xf5   : > { %v411_v62 = vadd.f32 %v403_v57, %v384_v58  ;;  %v412_v63 = vadd.f32 %v405_v56, %v385_v59 }
  0xf8   : > { %v430_v60 = vpop.permute.xlu1 %429  ;;  %v407_v61 = vpop.permute.xlu0 %406 }
  0xf9   : > { %v438_v0 = vadd.f32 %v430_v60, %v411_v62  ;;  %v413_v11 = vadd.f32 %v407_v61, %v386_v5 }
  0xfb   : > { %v507_v4 = vrot.slane %v438_v0, 1 }
  0xfc   : > { %v465_v1 = vpop.permute.xlu1 %464  ;;  %v432_v2 = vpop.permute.xlu0 %431 }
  0xfd   : > { %v439_v3 = vadd.f32 %v432_v2, %v412_v63  ;;  %v473_v24 = vadd.f32 %v465_v1, %v446_v15 }
  0xff   : > { %v508_v6 = vrot.slane %v439_v3, 1 }
 0x100   : > { %v467_v7 = vpop.permute.xlu0 %466  ;;  %v351_v8 = vpop.permute.xlu1 %350 }
 0x101   : > { %v509_v9 = vsel %vm506_vm2, %v507_v4, %v508_v6  ;;  %v474_v28 = vadd.f32 %v467_v7, %v447_v17  ;;  %v356_v29 = vadd.f32 %v351_v8, %v335_v18 }
 0x104   : > { %v434_v13 = vpop.permute.xlu0 %433  ;;  %v469_v14 = vpop.permute.xlu1 %468 }
 0x105   : > { %v440_v16 = vadd.f32 %v434_v13, %v413_v11  ;;  %v475_v36 = vadd.f32 %v469_v14, %v448_v26 }
 0x107   : > { %v510_v19 = vrot.slane %v440_v16, 1 }
 0x108   : > { %v353_v20 = vpop.permute.xlu0 %352  ;;  %v492_v22 = vpop.permute.xlu1 %491 }
 0x109   : > { %v511_v25 = vsel %vm506_vm2, %v508_v6, %v510_v19  ;;  %v500_v31 = vadd.f32 %v492_v22, %v473_v24  ;;  %v357_v23 = vadd.f32 %v353_v20, %v336_v30 }
 0x10b   : > { %v520_v37 = vrot.slane %v500_v31, 2 }
 0x10c   : > { %v494_v32 = vpop.permute.xlu0 %493  ;;  %v372_v33 = vpop.permute.xlu1 %371 }
 0x10d   : > { %v501_v34 = vadd.f32 %v494_v32, %v474_v28  ;;  %v377_v35 = vadd.f32 %v372_v33, %v356_v29 }
 0x10f   : > { %v521_v38 = vrot.slane %v501_v34, 2  ;;  %v514_v39 = vadd.f32 %v509_v9, %v377_v35 }
 0x110   : > { %v496_v40 = vpop.permute.xlu0 %495  ;;  %v374_v41 = vpop.permute.xlu1 %373 }
 0x111   : > { %v502_v42 = vadd.f32 %v496_v40, %v475_v36  ;;  %v378_v27 = vadd.f32 %v374_v41, %v357_v23  ;;  %v522_v43 = vsel %vm519_vm3, %v520_v37, %v521_v38 }
 0x112   : > { %v527_v44 = vadd.f32 %v522_v43, %v514_v39 }
 0x113   : > { %v523_v21 = vrot.slane %v502_v42, 2  ;;  %v515_v45 = vadd.f32 %v511_v25, %v378_v27 }
 0x114   : > { %821 = vmatprep.mubr.msk.f32.mxu0 %vm537_vm4, %v527_v44 }
 0x115   : > { %v524_v46 = vsel %vm519_vm3, %v521_v38, %v523_v21 }
 0x116   : > { %v528_v47 = vadd.f32 %v524_v46, %v515_v45 }
 0x118   : > { %822 = vmatmul.mubr.msk.f32.vlgmr.msra.gmra.mxu0 %vm537_vm4, %v528_v47 }
 0x1d8   : > { %v823_v48 = vpop.f32.mrf.mxu0 }
 0x1d9   : > { %620 = vst [vmem:[%s272_s29 + $0x8] sm:$0xff] %v823_v48  ;;  %v630_v50 = vmul.f32 %v823_v48, %v823_v48 }
 0x1da   : > { %v610_v49 = vpop.f32.mrf.mxu0 }
 0x1db   : > { %619 = vst [vmem:[%s272_s29] sm:$0xff] %v610_v49  ;;  %v621_v51 = vadd.f32 %v823_v48, %v610_v49  ;;  %v629_v52 = vmul.f32 %v610_v49, %v610_v49 }
 0x1dd   : > { %v622_v53 = vrot.slane %v621_v51, 4  ;;  %v631_v54 = vadd.f32 %v630_v50, %v629_v52 }
 0x1df   : > { %v623_v55 = vadd.f32 %v622_v53, %v621_v51  ;;  %v632_v56 = vrot.slane %v631_v54, 4 }
 0x1e1   : > { %v624_v57 = vrot.slane %v623_v55, 2  ;;  %v633_v58 = vadd.f32 %v632_v56, %v631_v54 }
 0x1e3   : > { %v625_v59 = vadd.f32 %v624_v57, %v623_v55  ;;  %v634_v60 = vrot.slane %v633_v58, 2 }
 0x1e5   : > { %v626_v61 = vrot.slane %v625_v59, 1  ;;  %v635_v62 = vadd.f32 %v634_v60, %v633_v58 }
 0x1e7   : > { %v627_v63 = vadd.f32 %v626_v61, %v625_v59  ;;  %v636_v0 = vrot.slane %v635_v62, 1 }
 0x1e9   : > { %628 = vst [vmem:[%s280_s8] sm:$0x1] %v627_v63  ;;  %v637_v1 = vadd.f32 %v636_v0, %v635_v62 }
 0x1eb   : > { %638 = vst [vmem:[%s280_s8 + $0x1] sm:$0x1] %v637_v1 }
 0x1ec PF: > { %s16_s20 = sadd.s32 1, %s875_s20   ;;  %s1063_s18 = smov %s871_s19 }
 0x1ed   : > { %p13_p5 = scmp.ge.s32.totalorder %s16_s20, 4   ;;  %s1064_s19 = smov %s1066_s21 }
 0x1ef   :  { %15 = sbr.rel (!%p13_p5) target bundleno = 2 (0x2), region = 78 }

</bundles_post_ra>
